<compile_context>
chip_gen: v5e
topology: v5e:2x2
jax: 0.10.0
libtpu: 0.0.40
codegen_flags: <defaults>
</compile_context>

<pallas_src>
import jax
import jax.numpy as jnp
from jax.experimental import pallas as pl
from jax.experimental.pallas import tpu as pltpu

BN_EPS = 1e-5


# ------------------------------ small helpers -------------------------------

def _round_up(x, m):
    return ((x + m - 1) // m) * m


def _pad2(x, rows, cols):
    r, c = x.shape
    return jnp.pad(x, ((0, rows - r), (0, cols - c)))


# ----------------------------- Pallas kernel --------------------------------

def make_gin_kernel(num_gin_layers, n_stages, np_rows, bn_eps=BN_EPS):
    """Fully fused GIN forward.

    Per GIN layer l (all inside one kernel invocation):
        x = (1 + eps_l) * h + adj @ h
        for each MLP stage s:  x = relu(BN_batchstats(x @ W_{l,s}))
    The last stage of each layer uses the GIN-level BatchNorm gamma/beta.
    Row masking makes the batch statistics exact despite sublane padding.
    """

    def kernel(scal_ref, nreal_ref, adj_ref, h_ref, w_ref, gb_ref, out_ref):
        inv_n = scal_ref[num_gin_layers]          # 1 / num_real_nodes
        n_real = nreal_ref[0]                     # real node count (int32)

        row_ids = jax.lax.broadcasted_iota(jnp.int32, (np_rows, 1), 0)
        row_mask = row_ids < n_real               # (Np, 1) True for real nodes

        adj = adj_ref[...]                        # bf16 (Np, Np)
        h_bf = h_ref[...]                         # bf16 (Np, Dp)
        h = h_bf.astype(jnp.float32)              # f32 copy for the eps term
        gb = gb_ref[...]                          # f32 (Rgb, Dp) gamma/beta

        for l in range(num_gin_layers):
            eps = scal_ref[l]
            # neighbor aggregation + eps self term (bf16 MXU, f32 accumulate)
            agg = jnp.dot(adj, h_bf, preferred_element_type=jnp.float32)
            x = (1.0 + eps) * h + agg             # f32 (Np, Dp)
            x_bf = x.astype(jnp.bfloat16)

            for s in range(n_stages):
                t = l * n_stages + s
                # Linear (bias is cancelled by the following batch-stat BN)
                y = jnp.dot(x_bf, w_ref[t],
                            preferred_element_type=jnp.float32)
                # masked batch statistics (padded rows excluded)
                ym = jnp.where(row_mask, y, 0.0)
                mean = jnp.sum(ym, axis=0, keepdims=True) * inv_n
                var = jnp.maximum(
                    jnp.sum(ym * ym, axis=0, keepdims=True) * inv_n
                    - mean * mean, 0.0)
                gamma = gb[2 * t:2 * t + 1, :]
                beta = gb[2 * t + 1:2 * t + 2, :]
                # folded BN affine + ReLU: two full-tile VPU ops
                scale = gamma * jax.lax.rsqrt(var + bn_eps)
                shift = beta - mean * scale
                x = jnp.maximum(y * scale + shift, 0.0)
                x_bf = x.astype(jnp.bfloat16)

            h, h_bf = x, x_bf

        out_ref[...] = h                          # f32; padded rows sliced off

    return kernel


# ------------------------------ GIN forward ----------------------------------

def gin_forward(feat, adj, params):
    """One pallas_call for the whole GIN forward pass."""
    N, Din = feat.shape
    hidden_dim = params["hidden_dim"]
    num_gin_layers = len(params["mlps"])          # == num_layers - 1
    n_stages = len(params["mlps"][0]["w"])        # == num_mlp_layers
    total_stages = num_gin_layers * n_stages

    Np = _round_up(max(N, 16), 16)                # bf16 sublane-packed rows
    Dp = _round_up(max(Din, hidden_dim, 1), 128)  # lane-dense feature dim

    adj_p = _pad2(adj, Np, Np).astype(jnp.bfloat16)
    h0 = _pad2(feat, Np, Dp).astype(jnp.bfloat16)

    # Stack every Linear weight (pre-transposed [in,out]) into one bf16
    # tensor and every BN gamma/beta pair into one f32 tensor.
    w_list, gb_rows = [], []
    for l in range(num_gin_layers):
        mlp = params["mlps"][l]
        for s in range(n_stages):
            w_list.append(_pad2(mlp["w"][s], Dp, Dp).astype(jnp.bfloat16))
            if s < n_stages - 1:
                g, be = mlp["bn_gamma"][s], mlp["bn_beta"][s]
            else:  # last Linear fused with the GIN-level BatchNorm + ReLU
                g, be = params["gin_bn_gamma"][l], params["gin_bn_beta"][l]
            gb_rows.append(_pad2(g, 1, Dp))
            gb_rows.append(_pad2(be, 1, Dp))
    w_all = jnp.stack(w_list)                     # (T, Dp, Dp) bf16
    Rgb = _round_up(2 * total_stages, 8)
    gb_all = _pad2(jnp.concatenate(gb_rows, axis=0), Rgb, Dp)   # (Rgb, Dp) f32

    scal = jnp.concatenate(
        [jnp.asarray(params["eps"], jnp.float32).reshape(-1),
         jnp.array([1.0 / N], jnp.float32)])      # [eps_0..eps_{L-1}, 1/N]
    nreal = jnp.array([N], jnp.int32)

    # advisory cost estimate + chip-aware scoped VMEM cap
    flops = (num_gin_layers * 2 * Np * Np * Dp
             + total_stages * 2 * Np * Dp * Dp)
    bytes_acc = (adj_p.size * 2 + h0.size * 2 + w_all.size * 2
                 + gb_all.size * 4 + Np * Dp * 4)
    try:
        vmem_cap = pltpu.get_tpu_info().vmem_capacity_bytes
    except Exception:
        vmem_cap = 64 * 1024 * 1024               # conservative (v7x)
    vmem_limit = int(min(int(0.75 * vmem_cap),
                         max(4 * bytes_acc + (4 << 20), 16 << 20)))

    kernel = make_gin_kernel(num_gin_layers, n_stages, Np)
    out = pl.pallas_call(
        kernel,
        out_shape=jax.ShapeDtypeStruct((Np, Dp), jnp.float32),
        in_specs=[
            pl.BlockSpec(memory_space=pltpu.MemorySpace.SMEM),   # eps..., 1/N
            pl.BlockSpec(memory_space=pltpu.MemorySpace.SMEM),   # n_real
            pl.BlockSpec((Np, Np), lambda: (0, 0)),              # adjacency
            pl.BlockSpec((Np, Dp), lambda: (0, 0)),              # node feats
            pl.BlockSpec((total_stages, Dp, Dp), lambda: (0, 0, 0)),  # weights
            pl.BlockSpec((Rgb, Dp), lambda: (0, 0)),             # gamma/beta
        ],
        out_specs=pl.BlockSpec((Np, Dp), lambda: (0, 0)),
        compiler_params=pltpu.CompilerParams(vmem_limit_bytes=vmem_limit),
        cost_estimate=pl.CostEstimate(
            flops=int(flops),
            transcendentals=int(total_stages * Dp),
            bytes_accessed=int(bytes_acc)),
    )(scal, nreal, adj_p, h0, w_all, gb_all)

    return out[:N, :hidden_dim]


# ------------------------------ Param init -----------------------------------

def init_params(key, num_layers, num_mlp_layers, input_dim, hidden_dim):
    params = {
        "eps": jnp.zeros((num_layers - 1,), jnp.float32),  # nn.Parameter zeros
        "mlps": [],
        "gin_bn_gamma": [],
        "gin_bn_beta": [],
        "hidden_dim": hidden_dim,
    }
    for layer in range(num_layers - 1):
        in_dim = input_dim if layer == 0 else hidden_dim
        if num_mlp_layers == 1:
            dims = [(in_dim, hidden_dim)]
        else:
            dims = [(in_dim, hidden_dim)]
            for _ in range(num_mlp_layers - 2):
                dims.append((hidden_dim, hidden_dim))
            dims.append((hidden_dim, hidden_dim))
        ws, bs, gammas, betas = [], [], [], []
        for (di, do) in dims:
            key, kw, kb = jax.random.split(key, 3)
            bound = 1.0 / jnp.sqrt(float(di))
            ws.append(jax.random.uniform(kw, (di, do), jnp.float32,
                                         minval=-bound, maxval=bound))
            # NOTE: bias is initialized for parity with nn.Linear but is NOT
            # used by the kernel -- it is exactly cancelled by the
            # batch-statistics BatchNorm that follows every Linear here.
            bs.append(jax.random.uniform(kb, (1, do), jnp.float32,
                                         minval=-bound, maxval=bound))
            gammas.append(jnp.ones((1, do), jnp.float32))   # BN defaults
            betas.append(jnp.zeros((1, do), jnp.float32))
        params["mlps"].append({"w": ws, "b": bs,
                               "bn_gamma": gammas, "bn_beta": betas})
        params["gin_bn_gamma"].append(jnp.ones((1, hidden_dim), jnp.float32))
        params["gin_bn_beta"].append(jnp.zeros((1, hidden_dim), jnp.float32))
    return params


# --------------------------------- Main ---------------------------------------

if __name__ == "__main__":
    # Small synthetic graph / model config.
    num_layers = 3        # => 2 GIN layers with MLPs
    num_mlp_layers = 2
    N = 16                # nodes
    input_dim = 8
    hidden_dim = 32

    key = jax.random.PRNGKey(0)
    key, kfeat, kadj, kmask, kparams = jax.random.split(key, 5)

    feat = jax.random.normal(kfeat, (N, input_dim), jnp.float32)

    # Dense weighted adjacency: adj[v, u] = weight of edge u -> v.
    edge_mask = (jax.random.uniform(kmask, (N, N)) < 0.3).astype(jnp.float32)
    edge_w = jax.random.uniform(kadj, (N, N), jnp.float32, minval=0.1, maxval=1.0)
    adj = edge_mask * edge_w

    params = init_params(kparams, num_layers, num_mlp_layers, input_dim, hidden_dim)

    out = gin_forward(feat, adj, params)
    out = jax.block_until_ready(out)

    assert out.shape == (N, hidden_dim), out.shape
    assert bool(jnp.all(jnp.isfinite(out)))
    print("KERNEL_OK")
</pallas_src>

<mosaic_0001>
module attributes {stable_mosaic.version = 11 : i64} {
  func.func @kernel(%arg0: memref<3xf32, #tpu.memory_space<smem>>, %arg1: memref<1xi32, #tpu.memory_space<smem>>, %arg2: memref<16x16xbf16, #tpu.memory_space<vmem>>, %arg3: memref<16x128xbf16, #tpu.memory_space<vmem>>, %arg4: memref<4x128x128xbf16, #tpu.memory_space<vmem>>, %arg5: memref<8x128xf32, #tpu.memory_space<vmem>>, %arg6: memref<16x128xf32, #tpu.memory_space<vmem>>) attributes {dimension_semantics = [], scalar_prefetch = 0 : i64, scratch_operands = 0 : i64, tpu.core_type = #tpu.core_type<tc>} {
    %c2 = arith.constant 2 : index
    %0 = memref.load %arg0[%c2] : memref<3xf32, #tpu.memory_space<smem>>
    %c0 = arith.constant 0 : index
    %1 = memref.load %arg1[%c0] : memref<1xi32, #tpu.memory_space<smem>>
    %2 = tpu.iota {dimensions = array<i32: 0>} : vector<16x1xi32>
    %3 = vector.broadcast %1 : i32 to vector<16x1xi32>
    %4 = arith.cmpi slt, %2, %3 : vector<16x1xi32>
    %c0_0 = arith.constant 0 : index
    %c0_1 = arith.constant 0 : index
    %5 = vector.load %arg2[%c0_0, %c0_1] : memref<16x16xbf16, #tpu.memory_space<vmem>>, vector<16x16xbf16>
    %c0_2 = arith.constant 0 : index
    %c0_3 = arith.constant 0 : index
    %6 = vector.load %arg3[%c0_2, %c0_3] : memref<16x128xbf16, #tpu.memory_space<vmem>>, vector<16x128xbf16>
    %7 = arith.extf %6 : vector<16x128xbf16> to vector<16x128xf32>
    %c0_4 = arith.constant 0 : index
    %c0_5 = arith.constant 0 : index
    %8 = vector.load %arg5[%c0_4, %c0_5] : memref<8x128xf32, #tpu.memory_space<vmem>>, vector<8x128xf32>
    %c0_6 = arith.constant 0 : index
    %9 = memref.load %arg0[%c0_6] : memref<3xf32, #tpu.memory_space<smem>>
    %cst = arith.constant dense<0.000000e+00> : vector<16x128xf32>
    %10 = tpu.matmul %5, %6, %cst {dimension_numbers = #tpu.dot_dimension_numbers<[1], [0], [0], [1], [0, 0, 1, 1], [], []>} : vector<16x16xbf16>, vector<16x128xbf16>, vector<16x128xf32> -> vector<16x128xf32>
    %cst_7 = arith.constant 1.000000e+00 : f32
    %11 = arith.addf %cst_7, %9 : f32
    %12 = vector.broadcast %11 : f32 to vector<16x128xf32>
    %13 = arith.mulf %12, %7 : vector<16x128xf32>
    %14 = arith.addf %13, %10 : vector<16x128xf32>
    %15 = arith.truncf %14 : vector<16x128xf32> to vector<16x128xbf16>
    %c0_8 = arith.constant 0 : index
    %c0_9 = arith.constant 0 : index
    %c0_10 = arith.constant 0 : index
    %16 = vector.load %arg4[%c0_8, %c0_9, %c0_10] : memref<4x128x128xbf16, #tpu.memory_space<vmem>>, vector<1x128x128xbf16>
    %17 = vector.shape_cast %16 : vector<1x128x128xbf16> to vector<128x128xbf16>
    %cst_11 = arith.constant dense<0.000000e+00> : vector<16x128xf32>
    %18 = tpu.matmul %15, %17, %cst_11 {dimension_numbers = #tpu.dot_dimension_numbers<[1], [0], [0], [1], [0, 0, 1, 1], [], []>} : vector<16x128xbf16>, vector<128x128xbf16>, vector<16x128xf32> -> vector<16x128xf32>
    %cst_12 = arith.constant 0.000000e+00 : f32
    %19 = vector.shape_cast %4 : vector<16x1xi1> to vector<16x1xi1>
    %20 = vector.broadcast %19 : vector<16x1xi1> to vector<16x128xi1>
    %21 = vector.broadcast %cst_12 : f32 to vector<16x128xf32>
    %22 = arith.select %20, %18, %21 : vector<16x128xi1>, vector<16x128xf32>
    %cst_13 = arith.constant dense<0.000000e+00> : vector<128xf32>
    %23 = vector.multi_reduction <add>, %22, %cst_13 [0] : vector<16x128xf32> to vector<128xf32>
    %24 = vector.shape_cast %23 : vector<128xf32> to vector<1x128xf32>
    %25 = vector.broadcast %0 : f32 to vector<1x128xf32>
    %26 = arith.mulf %24, %25 : vector<1x128xf32>
    %27 = arith.mulf %22, %22 : vector<16x128xf32>
    %cst_14 = arith.constant dense<0.000000e+00> : vector<128xf32>
    %28 = vector.multi_reduction <add>, %27, %cst_14 [0] : vector<16x128xf32> to vector<128xf32>
    %29 = vector.shape_cast %28 : vector<128xf32> to vector<1x128xf32>
    %30 = vector.broadcast %0 : f32 to vector<1x128xf32>
    %31 = arith.mulf %29, %30 : vector<1x128xf32>
    %32 = arith.mulf %26, %26 : vector<1x128xf32>
    %33 = arith.subf %31, %32 : vector<1x128xf32>
    %cst_15 = arith.constant 0.000000e+00 : f32
    %34 = vector.broadcast %cst_15 : f32 to vector<1x128xf32>
    %35 = arith.maximumf %33, %34 : vector<1x128xf32>
    %36 = vector.extract_strided_slice %8 {offsets = [0, 0], sizes = [1, 128], strides = [1, 1]} : vector<8x128xf32> to vector<1x128xf32>
    %37 = vector.extract_strided_slice %8 {offsets = [1, 0], sizes = [1, 128], strides = [1, 1]} : vector<8x128xf32> to vector<1x128xf32>
    %cst_16 = arith.constant 9.99999974E-6 : f32
    %38 = vector.broadcast %cst_16 : f32 to vector<1x128xf32>
    %39 = arith.addf %35, %38 : vector<1x128xf32>
    %40 = math.rsqrt %39 : vector<1x128xf32>
    %41 = arith.mulf %36, %40 : vector<1x128xf32>
    %42 = arith.mulf %26, %41 : vector<1x128xf32>
    %43 = arith.subf %37, %42 : vector<1x128xf32>
    %44 = vector.broadcast %41 : vector<1x128xf32> to vector<16x128xf32>
    %45 = arith.mulf %18, %44 : vector<16x128xf32>
    %46 = vector.broadcast %43 : vector<1x128xf32> to vector<16x128xf32>
    %47 = arith.addf %45, %46 : vector<16x128xf32>
    %cst_17 = arith.constant 0.000000e+00 : f32
    %48 = vector.broadcast %cst_17 : f32 to vector<16x128xf32>
    %49 = arith.maximumf %47, %48 : vector<16x128xf32>
    %50 = arith.truncf %49 : vector<16x128xf32> to vector<16x128xbf16>
    %c1 = arith.constant 1 : index
    %c0_18 = arith.constant 0 : index
    %c0_19 = arith.constant 0 : index
    %51 = vector.load %arg4[%c1, %c0_18, %c0_19] : memref<4x128x128xbf16, #tpu.memory_space<vmem>>, vector<1x128x128xbf16>
    %52 = vector.shape_cast %51 : vector<1x128x128xbf16> to vector<128x128xbf16>
    %cst_20 = arith.constant dense<0.000000e+00> : vector<16x128xf32>
    %53 = tpu.matmul %50, %52, %cst_20 {dimension_numbers = #tpu.dot_dimension_numbers<[1], [0], [0], [1], [0, 0, 1, 1], [], []>} : vector<16x128xbf16>, vector<128x128xbf16>, vector<16x128xf32> -> vector<16x128xf32>
    %cst_21 = arith.constant 0.000000e+00 : f32
    %54 = vector.shape_cast %4 : vector<16x1xi1> to vector<16x1xi1>
    %55 = vector.broadcast %54 : vector<16x1xi1> to vector<16x128xi1>
    %56 = vector.broadcast %cst_21 : f32 to vector<16x128xf32>
    %57 = arith.select %55, %53, %56 : vector<16x128xi1>, vector<16x128xf32>
    %cst_22 = arith.constant dense<0.000000e+00> : vector<128xf32>
    %58 = vector.multi_reduction <add>, %57, %cst_22 [0] : vector<16x128xf32> to vector<128xf32>
    %59 = vector.shape_cast %58 : vector<128xf32> to vector<1x128xf32>
    %60 = vector.broadcast %0 : f32 to vector<1x128xf32>
    %61 = arith.mulf %59, %60 : vector<1x128xf32>
    %62 = arith.mulf %57, %57 : vector<16x128xf32>
    %cst_23 = arith.constant dense<0.000000e+00> : vector<128xf32>
    %63 = vector.multi_reduction <add>, %62, %cst_23 [0] : vector<16x128xf32> to vector<128xf32>
    %64 = vector.shape_cast %63 : vector<128xf32> to vector<1x128xf32>
    %65 = vector.broadcast %0 : f32 to vector<1x128xf32>
    %66 = arith.mulf %64, %65 : vector<1x128xf32>
    %67 = arith.mulf %61, %61 : vector<1x128xf32>
    %68 = arith.subf %66, %67 : vector<1x128xf32>
    %cst_24 = arith.constant 0.000000e+00 : f32
    %69 = vector.broadcast %cst_24 : f32 to vector<1x128xf32>
    %70 = arith.maximumf %68, %69 : vector<1x128xf32>
    %71 = vector.extract_strided_slice %8 {offsets = [2, 0], sizes = [1, 128], strides = [1, 1]} : vector<8x128xf32> to vector<1x128xf32>
    %72 = vector.extract_strided_slice %8 {offsets = [3, 0], sizes = [1, 128], strides = [1, 1]} : vector<8x128xf32> to vector<1x128xf32>
    %cst_25 = arith.constant 9.99999974E-6 : f32
    %73 = vector.broadcast %cst_25 : f32 to vector<1x128xf32>
    %74 = arith.addf %70, %73 : vector<1x128xf32>
    %75 = math.rsqrt %74 : vector<1x128xf32>
    %76 = arith.mulf %71, %75 : vector<1x128xf32>
    %77 = arith.mulf %61, %76 : vector<1x128xf32>
    %78 = arith.subf %72, %77 : vector<1x128xf32>
    %79 = vector.broadcast %76 : vector<1x128xf32> to vector<16x128xf32>
    %80 = arith.mulf %53, %79 : vector<16x128xf32>
    %81 = vector.broadcast %78 : vector<1x128xf32> to vector<16x128xf32>
    %82 = arith.addf %80, %81 : vector<16x128xf32>
    %cst_26 = arith.constant 0.000000e+00 : f32
    %83 = vector.broadcast %cst_26 : f32 to vector<16x128xf32>
    %84 = arith.maximumf %82, %83 : vector<16x128xf32>
    %85 = arith.truncf %84 : vector<16x128xf32> to vector<16x128xbf16>
    %c1_27 = arith.constant 1 : index
    %86 = memref.load %arg0[%c1_27] : memref<3xf32, #tpu.memory_space<smem>>
    %cst_28 = arith.constant dense<0.000000e+00> : vector<16x128xf32>
    %87 = tpu.matmul %5, %85, %cst_28 {dimension_numbers = #tpu.dot_dimension_numbers<[1], [0], [0], [1], [0, 0, 1, 1], [], []>} : vector<16x16xbf16>, vector<16x128xbf16>, vector<16x128xf32> -> vector<16x128xf32>
    %cst_29 = arith.constant 1.000000e+00 : f32
    %88 = arith.addf %cst_29, %86 : f32
    %89 = vector.broadcast %88 : f32 to vector<16x128xf32>
    %90 = arith.mulf %89, %84 : vector<16x128xf32>
    %91 = arith.addf %90, %87 : vector<16x128xf32>
    %92 = arith.truncf %91 : vector<16x128xf32> to vector<16x128xbf16>
    %c2_30 = arith.constant 2 : index
    %c0_31 = arith.constant 0 : index
    %c0_32 = arith.constant 0 : index
    %93 = vector.load %arg4[%c2_30, %c0_31, %c0_32] : memref<4x128x128xbf16, #tpu.memory_space<vmem>>, vector<1x128x128xbf16>
    %94 = vector.shape_cast %93 : vector<1x128x128xbf16> to vector<128x128xbf16>
    %cst_33 = arith.constant dense<0.000000e+00> : vector<16x128xf32>
    %95 = tpu.matmul %92, %94, %cst_33 {dimension_numbers = #tpu.dot_dimension_numbers<[1], [0], [0], [1], [0, 0, 1, 1], [], []>} : vector<16x128xbf16>, vector<128x128xbf16>, vector<16x128xf32> -> vector<16x128xf32>
    %cst_34 = arith.constant 0.000000e+00 : f32
    %96 = vector.shape_cast %4 : vector<16x1xi1> to vector<16x1xi1>
    %97 = vector.broadcast %96 : vector<16x1xi1> to vector<16x128xi1>
    %98 = vector.broadcast %cst_34 : f32 to vector<16x128xf32>
    %99 = arith.select %97, %95, %98 : vector<16x128xi1>, vector<16x128xf32>
    %cst_35 = arith.constant dense<0.000000e+00> : vector<128xf32>
    %100 = vector.multi_reduction <add>, %99, %cst_35 [0] : vector<16x128xf32> to vector<128xf32>
    %101 = vector.shape_cast %100 : vector<128xf32> to vector<1x128xf32>
    %102 = vector.broadcast %0 : f32 to vector<1x128xf32>
    %103 = arith.mulf %101, %102 : vector<1x128xf32>
    %104 = arith.mulf %99, %99 : vector<16x128xf32>
    %cst_36 = arith.constant dense<0.000000e+00> : vector<128xf32>
    %105 = vector.multi_reduction <add>, %104, %cst_36 [0] : vector<16x128xf32> to vector<128xf32>
    %106 = vector.shape_cast %105 : vector<128xf32> to vector<1x128xf32>
    %107 = vector.broadcast %0 : f32 to vector<1x128xf32>
    %108 = arith.mulf %106, %107 : vector<1x128xf32>
    %109 = arith.mulf %103, %103 : vector<1x128xf32>
    %110 = arith.subf %108, %109 : vector<1x128xf32>
    %cst_37 = arith.constant 0.000000e+00 : f32
    %111 = vector.broadcast %cst_37 : f32 to vector<1x128xf32>
    %112 = arith.maximumf %110, %111 : vector<1x128xf32>
    %113 = vector.extract_strided_slice %8 {offsets = [4, 0], sizes = [1, 128], strides = [1, 1]} : vector<8x128xf32> to vector<1x128xf32>
    %114 = vector.extract_strided_slice %8 {offsets = [5, 0], sizes = [1, 128], strides = [1, 1]} : vector<8x128xf32> to vector<1x128xf32>
    %cst_38 = arith.constant 9.99999974E-6 : f32
    %115 = vector.broadcast %cst_38 : f32 to vector<1x128xf32>
    %116 = arith.addf %112, %115 : vector<1x128xf32>
    %117 = math.rsqrt %116 : vector<1x128xf32>
    %118 = arith.mulf %113, %117 : vector<1x128xf32>
    %119 = arith.mulf %103, %118 : vector<1x128xf32>
    %120 = arith.subf %114, %119 : vector<1x128xf32>
    %121 = vector.broadcast %118 : vector<1x128xf32> to vector<16x128xf32>
    %122 = arith.mulf %95, %121 : vector<16x128xf32>
    %123 = vector.broadcast %120 : vector<1x128xf32> to vector<16x128xf32>
    %124 = arith.addf %122, %123 : vector<16x128xf32>
    %cst_39 = arith.constant 0.000000e+00 : f32
    %125 = vector.broadcast %cst_39 : f32 to vector<16x128xf32>
    %126 = arith.maximumf %124, %125 : vector<16x128xf32>
    %127 = arith.truncf %126 : vector<16x128xf32> to vector<16x128xbf16>
    %c3 = arith.constant 3 : index
    %c0_40 = arith.constant 0 : index
    %c0_41 = arith.constant 0 : index
    %128 = vector.load %arg4[%c3, %c0_40, %c0_41] : memref<4x128x128xbf16, #tpu.memory_space<vmem>>, vector<1x128x128xbf16>
    %129 = vector.shape_cast %128 : vector<1x128x128xbf16> to vector<128x128xbf16>
    %cst_42 = arith.constant dense<0.000000e+00> : vector<16x128xf32>
    %130 = tpu.matmul %127, %129, %cst_42 {dimension_numbers = #tpu.dot_dimension_numbers<[1], [0], [0], [1], [0, 0, 1, 1], [], []>} : vector<16x128xbf16>, vector<128x128xbf16>, vector<16x128xf32> -> vector<16x128xf32>
    %cst_43 = arith.constant 0.000000e+00 : f32
    %131 = vector.shape_cast %4 : vector<16x1xi1> to vector<16x1xi1>
    %132 = vector.broadcast %131 : vector<16x1xi1> to vector<16x128xi1>
    %133 = vector.broadcast %cst_43 : f32 to vector<16x128xf32>
    %134 = arith.select %132, %130, %133 : vector<16x128xi1>, vector<16x128xf32>
    %cst_44 = arith.constant dense<0.000000e+00> : vector<128xf32>
    %135 = vector.multi_reduction <add>, %134, %cst_44 [0] : vector<16x128xf32> to vector<128xf32>
    %136 = vector.shape_cast %135 : vector<128xf32> to vector<1x128xf32>
    %137 = vector.broadcast %0 : f32 to vector<1x128xf32>
    %138 = arith.mulf %136, %137 : vector<1x128xf32>
    %139 = arith.mulf %134, %134 : vector<16x128xf32>
    %cst_45 = arith.constant dense<0.000000e+00> : vector<128xf32>
    %140 = vector.multi_reduction <add>, %139, %cst_45 [0] : vector<16x128xf32> to vector<128xf32>
    %141 = vector.shape_cast %140 : vector<128xf32> to vector<1x128xf32>
    %142 = vector.broadcast %0 : f32 to vector<1x128xf32>
    %143 = arith.mulf %141, %142 : vector<1x128xf32>
    %144 = arith.mulf %138, %138 : vector<1x128xf32>
    %145 = arith.subf %143, %144 : vector<1x128xf32>
    %cst_46 = arith.constant 0.000000e+00 : f32
    %146 = vector.broadcast %cst_46 : f32 to vector<1x128xf32>
    %147 = arith.maximumf %145, %146 : vector<1x128xf32>
    %148 = vector.extract_strided_slice %8 {offsets = [6, 0], sizes = [1, 128], strides = [1, 1]} : vector<8x128xf32> to vector<1x128xf32>
    %149 = vector.extract_strided_slice %8 {offsets = [7, 0], sizes = [1, 128], strides = [1, 1]} : vector<8x128xf32> to vector<1x128xf32>
    %cst_47 = arith.constant 9.99999974E-6 : f32
    %150 = vector.broadcast %cst_47 : f32 to vector<1x128xf32>
    %151 = arith.addf %147, %150 : vector<1x128xf32>
    %152 = math.rsqrt %151 : vector<1x128xf32>
    %153 = arith.mulf %148, %152 : vector<1x128xf32>
    %154 = arith.mulf %138, %153 : vector<1x128xf32>
    %155 = arith.subf %149, %154 : vector<1x128xf32>
    %156 = vector.broadcast %153 : vector<1x128xf32> to vector<16x128xf32>
    %157 = arith.mulf %130, %156 : vector<16x128xf32>
    %158 = vector.broadcast %155 : vector<1x128xf32> to vector<16x128xf32>
    %159 = arith.addf %157, %158 : vector<16x128xf32>
    %cst_48 = arith.constant 0.000000e+00 : f32
    %160 = vector.broadcast %cst_48 : f32 to vector<16x128xf32>
    %161 = arith.maximumf %159, %160 : vector<16x128xf32>
    %c0_49 = arith.constant 0 : index
    %c0_50 = arith.constant 0 : index
    %162 = vector.load %arg6[%c0_49, %c0_50] : memref<16x128xf32, #tpu.memory_space<vmem>>, vector<16x128xf32>
    tpu.vector_store %arg6[%c0_49, %c0_50], %161 {strides = array<i32>} : memref<16x128xf32, #tpu.memory_space<vmem>>, vector<16x128xf32>,
    return
  }
}

</mosaic_0001>

<bundles_post_ra>
// kernel: tpu_custom_call.1
= control target key start
LH: loop header
LB: loop body
LE: loop exit
PB: predicated region body
PF: predicated region fallthrough
CT: control target
= control target key end

     0   :  { %12 = vsyncpa [#allocation6], 0  ;;  %s1167_s0 = inlined_call_operand.vmem [shape: f32[3], index: 0, kind: input, shape index: {}]   ;;  %s1168_s1 = inlined_call_operand.<no memory space> [shape: s32[1], index: 1, kind: input, shape index: {}]   ;;  %s1169_s2 = inlined_call_operand.hbm [shape: bf16[16,16], index: 2, kind: input, shape index: {}]   ;;  %s1170_s3 = inlined_call_operand.hbm [shape: bf16[16,128], index: 3, kind: input, shape index: {}]   ;;  %s1171_s4 = inlined_call_operand.hbm [shape: bf16[4,128,128], index: 4, kind: input, shape index: {}]   ;;  %s1172_s5 = inlined_call_operand.hbm [shape: f32[8,128], index: 5, kind: input, shape index: {}]   ;;  %s1173_s6 = inlined_call_operand.hbm [shape: f32[16,128], index: 6, kind: output, shape index: {}]  }
   0x1   :  { %13 = vsyncpa [#allocation4], 0 }
   0x2   :  { %14 = vsyncpa [#allocation9], 0 }
   0x3   :  { %15 = vsyncpa [#allocation12], 0 }
   0x4   :  { %16 = vsyncpa [#allocation5], 0  ;;  %s45_s23 = sshll.u32 %s1170_s3, 4  ;;  %s1047_s24 = smov [#allocation8]   ;;  %s46_s23 = int_to_ptr.hbm [resolvable:$true] %s45_s23 }
   0x5   :  { %s47_s25 = sshll.u32 %s1047_s24, 4  ;;  %s22_s28 = sshll.u32 %s1167_s0, 4  ;;  %s48_s25 = int_to_ptr.vmem [resolvable:$true] %s47_s25  ;;  %s23_s28 = int_to_ptr.vmem [resolvable:$true] %s22_s28 }
   0x6   :  { %s1048_s29 = smov 64   ;;  %s1049_s30 = smov 4  }
   0x7   :  { %53 = dma.hbm_to_vmem [thread:$0]  %s46_s23, 128, %s48_s25, [#allocation9], %s1048_s29, %s1048_s29, %s1049_s30  }
   0x8   :  { %s1050_s7 = smov [#allocation3]   ;;  %s32_s10 = sshll.u32 %s1169_s2, 4  ;;  %s33_s10 = int_to_ptr.hbm [resolvable:$true] %s32_s10 }
   0x9   :  { %25 = dma.vmem_to_smem %s23_s28, 16, %s1050_s7, [#allocation6]  }
   0xa   :  { %s1051_s3 = smov [#allocation7]   ;;  %s58_s14 = sshll.u32 %s1171_s4, 4  ;;  %s59_s14 = int_to_ptr.hbm [resolvable:$true] %s58_s14 }
   0xb   :  { %s34_s11 = sshll.u32 %s1051_s3, 4  ;;  %s1052_s0 = smov [#allocation10]   ;;  %s35_s11 = int_to_ptr.vmem [resolvable:$true] %s34_s11 }
   0xc   :  { %40 = dma.hbm_to_vmem [thread:$0]  %s33_s10, 128, %s35_s11, [#allocation4], %s1048_s29, %s1048_s29, %s1049_s30  }
   0xd   :  { %s60_s15 = sshll.u32 %s1052_s0, 4  ;;  %s72_s18 = sshll.u32 %s1172_s5, 4  ;;  %s61_s15 = int_to_ptr.vmem [resolvable:$true] %s60_s15  ;;  %s73_s18 = int_to_ptr.hbm [resolvable:$true] %s72_s18 }
   0xe   :  { %66 = dma.hbm_to_vmem [thread:$0]  %s59_s14, 4096, %s61_s15, [#allocation9], %s1048_s29, %s1048_s29, %s1049_s30  }
   0xf   :  { %s1053_s2 = smov [#allocation11]  }
  0x10   :  { %s74_s19 = sshll.u32 %s1053_s2, 4  ;;  %s75_s19 = int_to_ptr.vmem [resolvable:$true] %s74_s19 }
  0x11   :  { %77 = dma.hbm_to_vmem [thread:$0]  %s73_s18, 128, %s75_s19, [#allocation12]  }
  0x12   :  { %1037 = dma.done.wait [#allocation6], 16  }
  0x13   :  { %1038 = vsyncadd [#allocation6], 4294967280 }
  0x14   :  { %1039 = dma.done.wait [#allocation4], 128  }
  0x15   :  { %1040 = vsyncadd [#allocation4], 4294967168 }
  0x16   :  { %1041 = dma.done.wait [#allocation9], 4224  }
  0x17   :  { %1042 = vsyncadd [#allocation9], 4294963072 }
  0x18   :  { %1043 = dma.done.wait [#allocation12], 128  }
  0x19   :  { %1044 = vsyncadd [#allocation12], 4294967168 }
  0x1a   :  { %98 = sfence }
  0x1b   :  { %v854_v0 = vld [vmem:[#allocation8] sm:$0xff]  ;;  %v1107_v2 = vld [vmem:[#allocation7] sm:$0xff]  ;;  %vm127_vm0 = vcmask 130048   ;;  %v860_v4 = vld [vmem:[#allocation10 + $0x28] sm:$0xff]  ;;  %s115_s4 = sld [smem:[#allocation3]]  ;;  %v102_v21 = vlaneseq  ;;  %v105_v24 = vstv %s1168_s1  ;;  %s1054_s24 = smov [#allocation13]  }
  0x1c   :  { %v862_v1 = vld [vmem:[#allocation10 + $0x38] sm:$0xff]  ;;  %138 = vmatpush.bf16.msra.mxu0 %v854_v0  ;;  %v861_v3 = vld [vmem:[#allocation10 + $0x30] sm:$0xff]  ;;  %v859_v5 = vld [vmem:[#allocation10 + $0x20] sm:$0xff]  ;;  %s713_s1 = sld [smem:[#allocation3 + $0x2]]  ;;  %s695_s25 = sshll.u32 %s1054_s24, 4  ;;  %s696_s25 = int_to_ptr.vmem [resolvable:$true] %s695_s25 }
  0x1d   :  { %216 = vmatpush.bf16.msra.mxu1 %v862_v1  ;;  %v858_v6 = vld [vmem:[#allocation10 + $0x18] sm:$0xff]  ;;  %v857_v7 = vld [vmem:[#allocation10 + $0x10] sm:$0xff]  ;;  %v856_v8 = vld [vmem:[#allocation10 + $0x8] sm:$0xff]  ;;  %v103_v22 = vshrl.u32 %v102_v21, 7  ;;  %s787_s22 = sld [smem:[#allocation3 + $0x1]]  ;;  %s697_s28 = sshll.u32 %s1173_s6, 4  ;;  %s698_s28 = int_to_ptr.hbm [resolvable:$true] %s697_s28 }
  0x1e   :  { %v855_v9 = vld [vmem:[#allocation10] sm:$0xff]  ;;  %v110_v10 = vld [vmem:[#allocation8] sm:$0xff]   ;;  %v869_v30 = vld [vmem:[#allocation10 + $0x70] sm:$0xff]  ;;  %s1055_s29 = smov 128   ;;  %s1056_s30 = smov 8  }
  0x1f   :  { %722 = vmatmul.msk.bf16.vlgmr.msra.gmra.mxu0 %vm127_vm0, %v1107_v2  ;;  %v112_v12 = vunpack.c.l.bf16 %v110_v10  ;;  %v113_v13 = vunpack.c.h.bf16 %v110_v10  ;;  %v104_v25 = vadd.s32 8, %v103_v22  ;;  %v870_v26 = vld [vmem:[#allocation10 + $0x78] sm:$0xff]  ;;  %vm1116_vm1 = vcmp.lt.s32.totalorder %v103_v22, %v105_v24  ;;  %v868_v36 = vld [vmem:[#allocation10 + $0x68] sm:$0xff]  ;;  %v867_v41 = vld [vmem:[#allocation10 + $0x60] sm:$0xff] }
  0x20   :  { %349 = vmatpush.bf16.msra.mxu2 %v870_v26  ;;  %v866_v46 = vld [vmem:[#allocation10 + $0x58] sm:$0xff]  ;;  %v865_v52 = vld [vmem:[#allocation10 + $0x50] sm:$0xff]  ;;  %v864_v57 = vld [vmem:[#allocation10 + $0x48] sm:$0xff] }
  0x21   :  { %217 = vmatpush.bf16.msra.mxu1 %v861_v3  ;;  %s145_s5 = sadd.f32 1.0, %s115_s4  ;;  %vm1120_vm2 = vcmp.lt.s32.totalorder %v104_v25, %v105_v24  ;;  %v863_v60 = vld [vmem:[#allocation10 + $0x40] sm:$0xff] }
  0x22   :  { %v1129_v49 = vstv %s713_s1 }
  0x23   :  { %v146_v14 = vstv %s145_s5  ;;  %s427_s23 = sadd.f32 1.0, %s787_s22 }
  0x24   :  { %v147_v15 = vmul.f32 %v146_v14, %v112_v12  ;;  %v148_v16 = vmul.f32 %v146_v14, %v113_v13  ;;  %350 = vmatpush.bf16.msra.mxu2 %v869_v30 }
  0x25   :  { %218 = vmatpush.bf16.msra.mxu1 %v860_v4  ;;  %v1133_v4 = vld [vmem:[#allocation11] sm:$0xff] }
  0x28   :  { %351 = vmatpush.bf16.msra.mxu2 %v868_v36 }
  0x29   :  { %219 = vmatpush.bf16.msra.mxu1 %v859_v5 }
  0x2c   :  { %352 = vmatpush.bf16.msra.mxu2 %v867_v41 }
  0x2d   :  { %220 = vmatpush.bf16.msra.mxu1 %v858_v6 }
  0x30   :  { %353 = vmatpush.bf16.msra.mxu2 %v866_v46 }
  0x31   :  { %221 = vmatpush.bf16.msra.mxu1 %v857_v7 }
  0x34   :  { %354 = vmatpush.bf16.msra.mxu2 %v865_v52  ;;  %v877_v52 = vld [vmem:[#allocation10 + $0xb0] sm:$0xff] }
  0x35   :  { %222 = vmatpush.bf16.msra.mxu1 %v856_v8 }
  0x38   :  { %355 = vmatpush.bf16.msra.mxu2 %v864_v57 }
  0x39   :  { %223 = vmatpush.bf16.msra.mxu1 %v855_v9 }
  0x3c   :  { %356 = vmatpush.bf16.msra.mxu2 %v863_v60 }
  0x9c   :  { %v140_v11 = vpop.f32.mrf.mxu0 }
  0x9d   :  { %v149_v18 = vadd.f32 %v147_v15, %v140_v11 }
  0xa4   :  { %v142_v17 = vpop.f32.mrf.mxu0 }
  0xa5   :  { %v150_v19 = vadd.f32 %v148_v16, %v142_v17 }
  0xa7   :  { %v151_v20 = vpack.c.bf16 %v150_v19, %v149_v18 }
  0xa9   :  { %224 = vmatmul.bf16.vlgmr.msra.gmra.mxu1 %v151_v20 }
 0x126   :  { %v1111_v23 = vpop.f32.mrf.mxu1 }
 0x127   :  { %v234_v29 = vsel %vm1116_vm1, %v1111_v23, 0.0 }
 0x128   :  { %v245_v33 = vmul.f32 %v234_v29, %v234_v29 }
 0x12e   :  { %v227_v31 = vpop.f32.mrf.mxu1 }
 0x12f   :  { %v235_v32 = vsel %vm1120_vm2, %v227_v31, 0.0 }
 0x130   :  { %v236_v34 = vadd.f32 %v235_v32, %v234_v29  ;;  %v246_v35 = vmul.f32 %v235_v32, %v235_v32 }
 0x132   :  { %v237_v37 = vrot.slane %v236_v34, 4  ;;  %v247_v38 = vadd.f32 %v246_v35, %v245_v33 }
 0x134   :  { %v238_v39 = vadd.f32 %v237_v37, %v236_v34  ;;  %v248_v40 = vrot.slane %v247_v38, 4 }
 0x136   :  { %v239_v42 = vrot.slane %v238_v39, 2  ;;  %v249_v43 = vadd.f32 %v248_v40, %v247_v38 }
 0x138   :  { %v240_v44 = vadd.f32 %v239_v42, %v238_v39  ;;  %v250_v45 = vrot.slane %v249_v43, 2 }
 0x13a   :  { %v241_v47 = vrot.slane %v240_v44, 1  ;;  %v251_v48 = vadd.f32 %v250_v45, %v249_v43 }
 0x13c   :  { %v242_v50 = vadd.f32 %v241_v47, %v240_v44  ;;  %v252_v51 = vrot.slane %v251_v48, 1 }
 0x13e   :  { %v244_v53 = vmul.f32 %v1129_v49, %v242_v50  ;;  %v253_v54 = vadd.f32 %v252_v51, %v251_v48  ;;  %v878_v48 = vld [vmem:[#allocation10 + $0xb8] sm:$0xff] }
 0x13f   :  { %499 = vmatpush.bf16.msrb.mxu0 %v878_v48  ;;  %v881_v48 = vld [vmem:[#allocation10 + $0xd0] sm:$0xff] }
 0x140   :  { %v254_v55 = vmul.f32 %v253_v54, %v1129_v49  ;;  %v255_v56 = vmul.f32 %v244_v53, %v244_v53 }
 0x142   :  { %v256_v58 = vsub.f32 %v254_v55, %v255_v56  ;;  %v876_v55 = vld [vmem:[#allocation10 + $0xa8] sm:$0xff] }
 0x143   :  { %500 = vmatpush.bf16.msrb.mxu0 %v877_v52 }
 0x144   :  { %v257_v59 = vmax.f32 %v256_v58, 0.0  ;;  %v875_v58 = vld [vmem:[#allocation10 + $0xa0] sm:$0xff] }
 0x146   :  { %v258_v61 = vadd.f32 1e-05, %v257_v59 }
 0x147   :  { %501 = vmatpush.bf16.msrb.mxu0 %v876_v55 }
 0x148   :  { %897 = vrsqrt.f32 %v258_v61  ;;  %vm265_vm4 = vweird.f32 %v258_v61 }
 0x14b   :  { %502 = vmatpush.bf16.msrb.mxu0 %v875_v58 }
 0x14e   :  { %v898_v62 = vpop.eup %897 }
 0x14f   :  { %v260_v63 = vmul.f32 %v898_v62, %v258_v61  ;;  %vm266_vm3 = vweird.f32 %v898_v62  ;;  %v874_v61 = vld [vmem:[#allocation10 + $0x98] sm:$0xff] }
 0x150   :  { %vm267_vm5 = vmor %vm265_vm4, %vm266_vm3  ;;  %503 = vmatpush.bf16.msrb.mxu0 %v874_v61 }
 0x151   :  { %v261_v0 = vmul.f32 %v898_v62, %v260_v63 }
 0x153   :  { %v262_v1 = vmul.f32 0.5, %v261_v0 }
 0x155   :  { %v263_v3 = vsub.f32 1.5, %v262_v1 }
 0x157   :  { %v264_v5 = vmul.f32 %v898_v62, %v263_v3 }
 0x159   :  { %v268_v6 = vsel %vm267_vm5, %v898_v62, %v264_v5 }
 0x15a   :  { %v269_v7 = vmul.f32 %v268_v6, %v1133_v4 }
 0x15c   :  { %v270_v8 = vmul.f32 %v269_v7, %v244_v53  ;;  %v275_v10 = vperm.slane %v269_v7, 0 }
 0x15e   :  { %v272_v9 = vrot.slane %v270_v8, 7  ;;  %v276_v12 = vmul.f32 %v275_v10, %v1111_v23  ;;  %v277_v13 = vmul.f32 %v275_v10, %v227_v31 }
 0x160   :  { %v274_v11 = vsub.f32 %v1133_v4, %v272_v9 }
 0x162   :  { %v278_v14 = vperm.slane %v274_v11, 1 }
 0x164   :  { %v280_v15 = vadd.f32 %v278_v14, %v277_v13  ;;  %v279_v16 = vadd.f32 %v278_v14, %v276_v12  ;;  %v873_v12 = vld [vmem:[#allocation10 + $0x90] sm:$0xff]  ;;  %v872_v13 = vld [vmem:[#allocation10 + $0x88] sm:$0xff]  ;;  %v871_v14 = vld [vmem:[#allocation10 + $0x80] sm:$0xff] }
 0x165   :  { %504 = vmatpush.bf16.msrb.mxu0 %v873_v12 }
 0x166   :  { %v282_v17 = vmax.f32 %v280_v15, 0.0  ;;  %v281_v18 = vmax.f32 %v279_v16, 0.0  ;;  %v428_v16 = vstv %s427_s23 }
 0x168   :  { %v283_v19 = vpack.c.bf16 %v282_v17, %v281_v18 }
 0x169   :  { %505 = vmatpush.bf16.msrb.mxu0 %v872_v13 }
 0x16a   :  { %357 = vmatmul.bf16.vlgmr.msra.gmra.mxu2 %v283_v19 }
 0x16d   :  { %506 = vmatpush.bf16.msrb.mxu0 %v871_v14 }
 0x1ed   :  { %v358_v20 = vpop.f32.mrf.mxu2 }
 0x1ee   :  { %v363_v21 = vsel %vm1116_vm1, %v358_v20, 0.0 }
 0x1ef   :  { %v373_v25 = vmul.f32 %v363_v21, %v363_v21 }
 0x1f5   :  { %v360_v22 = vpop.f32.mrf.mxu2 }
 0x1f6   :  { %v364_v24 = vsel %vm1120_vm2, %v360_v22, 0.0 }
 0x1f7   :  { %v365_v26 = vadd.f32 %v364_v24, %v363_v21  ;;  %v374_v29 = vmul.f32 %v364_v24, %v364_v24 }
 0x1f9   :  { %v366_v23 = vrot.slane %v365_v26, 4  ;;  %v375_v30 = vadd.f32 %v374_v29, %v373_v25  ;;  %v886_v25 = vld [vmem:[#allocation10 + $0xf8] sm:$0xff] }
 0x1fb   :  { %v367_v31 = vadd.f32 %v366_v23, %v365_v26  ;;  %v376_v32 = vrot.slane %v375_v30, 4  ;;  %v885_v26 = vld [vmem:[#allocation10 + $0xf0] sm:$0xff] }
 0x1fd   :  { %v368_v33 = vrot.slane %v367_v31, 2  ;;  %v377_v34 = vadd.f32 %v376_v32, %v375_v30 }
 0x1ff   :  { %v369_v35 = vadd.f32 %v368_v33, %v367_v31  ;;  %v378_v36 = vrot.slane %v377_v34, 2  ;;  %v884_v33 = vld [vmem:[#allocation10 + $0xe8] sm:$0xff] }
 0x201   :  { %v370_v37 = vrot.slane %v369_v35, 1  ;;  %v379_v38 = vadd.f32 %v378_v36, %v377_v34 }
 0x203   :  { %v371_v39 = vadd.f32 %v370_v37, %v369_v35  ;;  %v380_v40 = vrot.slane %v379_v38, 1 }
 0x205   :  { %v372_v41 = vmul.f32 %v371_v39, %v1129_v49  ;;  %v381_v42 = vadd.f32 %v380_v40, %v379_v38  ;;  %v883_v38 = vld [vmem:[#allocation10 + $0xe0] sm:$0xff] }
 0x207   :  { %v382_v43 = vmul.f32 %v381_v42, %v1129_v49  ;;  %v383_v44 = vmul.f32 %v372_v41, %v372_v41 }
 0x209   :  { %v384_v45 = vsub.f32 %v382_v43, %v383_v44  ;;  %v882_v43 = vld [vmem:[#allocation10 + $0xd8] sm:$0xff] }
 0x20b   :  { %v385_v46 = vmax.f32 %v384_v45, 0.0 }
 0x20d   :  { %v386_v47 = vadd.f32 1e-05, %v385_v46 }
 0x20f   :  { %899 = vrsqrt.f32 %v386_v47  ;;  %vm393_vm7 = vweird.f32 %v386_v47 }
 0x215   :  { %v900_v50 = vpop.eup %899 }
 0x216   :  { %v388_v51 = vmul.f32 %v900_v50, %v386_v47  ;;  %vm394_vm6 = vweird.f32 %v900_v50 }
 0x217   :  { %vm395_vm8 = vmor %vm393_vm7, %vm394_vm6 }
 0x218   :  { %v389_v53 = vmul.f32 %v900_v50, %v388_v51 }
 0x21a   :  { %v390_v54 = vmul.f32 0.5, %v389_v53 }
 0x21c   :  { %v391_v56 = vsub.f32 1.5, %v390_v54  ;;  %v880_v54 = vld [vmem:[#allocation10 + $0xc8] sm:$0xff] }
 0x21e   :  { %v392_v57 = vmul.f32 %v900_v50, %v391_v56 }
 0x220   :  { %v396_v59 = vsel %vm395_vm8, %v900_v50, %v392_v57  ;;  %v879_v57 = vld [vmem:[#allocation10 + $0xc0] sm:$0xff] }
 0x221   :  { %v397_v60 = vmul.f32 %v396_v59, %v1133_v4 }
 0x223   :  { %v398_v62 = vmul.f32 %v397_v60, %v372_v41  ;;  %v403_v63 = vperm.slane %v397_v60, 2 }
 0x225   :  { %v400_v0 = vrot.slane %v398_v62, 7  ;;  %v405_v3 = vmul.f32 %v403_v63, %v360_v22  ;;  %v404_v5 = vmul.f32 %v403_v63, %v358_v20 }
 0x227   :  { %v402_v1 = vsub.f32 %v1133_v4, %v400_v0 }
 0x229   :  { %v406_v6 = vperm.slane %v402_v1, 3 }
 0x22b   :  { %v407_v7 = vadd.f32 %v406_v6, %v404_v5  ;;  %v408_v8 = vadd.f32 %v406_v6, %v405_v3 }
 0x22d   :  { %v409_v9 = vmax.f32 %v407_v7, 0.0  ;;  %v410_v10 = vmax.f32 %v408_v8, 0.0 }
 0x22f   :  { %v411_v11 = vpack.c.bf16 %v410_v10, %v409_v9  ;;  %v429_v17 = vmul.f32 %v428_v16, %v409_v9  ;;  %v430_v18 = vmul.f32 %v428_v16, %v410_v10 }
 0x231   :  { %420 = vmatpush.bf16.msra.mxu3 %v411_v11 }
 0x234   :  { %788 = vmatmul.msk.bf16.vlgmr.msra.gmra.mxu3 %vm127_vm0, %v1107_v2 }
 0x235   :  { %627 = vmatpush.bf16.msrb.mxu3 %v886_v25 }
 0x239   :  { %628 = vmatpush.bf16.msrb.mxu3 %v885_v26 }
 0x23d   :  { %629 = vmatpush.bf16.msrb.mxu3 %v884_v33 }
 0x241   :  { %630 = vmatpush.bf16.msrb.mxu3 %v883_v38 }
 0x245   :  { %631 = vmatpush.bf16.msrb.mxu3 %v882_v43 }
 0x249   :  { %632 = vmatpush.bf16.msrb.mxu3 %v881_v48 }
 0x24d   :  { %633 = vmatpush.bf16.msrb.mxu3 %v880_v54 }
 0x251   :  { %634 = vmatpush.bf16.msrb.mxu3 %v879_v57 }
 0x2b7   :  { %v422_v15 = vpop.f32.mrf.mxu3 }
 0x2b8   :  { %v431_v20 = vadd.f32 %v429_v17, %v422_v15 }
 0x2bf   :  { %v424_v19 = vpop.f32.mrf.mxu3 }
 0x2c0   :  { %v432_v21 = vadd.f32 %v430_v18, %v424_v19 }
 0x2c2   :  { %v433_v22 = vpack.c.bf16 %v432_v21, %v431_v20 }
 0x2c4   :  { %507 = vmatmul.bf16.vlgmr.msrb.gmra.mxu0 %v433_v22 }
 0x341   :  { %v508_v24 = vpop.f32.mrf.mxu0 }
 0x342   :  { %v513_v2 = vsel %vm1116_vm1, %v508_v24, 0.0 }
 0x343   :  { %v523_v30 = vmul.f32 %v513_v2, %v513_v2 }
 0x349   :  { %v510_v29 = vpop.f32.mrf.mxu0 }
 0x34a   :  { %v514_v23 = vsel %vm1120_vm2, %v510_v29, 0.0 }
 0x34b   :  { %v515_v31 = vadd.f32 %v514_v23, %v513_v2  ;;  %v524_v32 = vmul.f32 %v514_v23, %v514_v23 }
 0x34d   :  { %v516_v34 = vrot.slane %v515_v31, 4  ;;  %v525_v35 = vadd.f32 %v524_v32, %v523_v30 }
 0x34f   :  { %v517_v36 = vadd.f32 %v516_v34, %v515_v31  ;;  %v526_v37 = vrot.slane %v525_v35, 4 }
 0x351   :  { %v518_v39 = vrot.slane %v517_v36, 2  ;;  %v527_v40 = vadd.f32 %v526_v37, %v525_v35 }
 0x353   :  { %v519_v41 = vadd.f32 %v518_v39, %v517_v36  ;;  %v528_v42 = vrot.slane %v527_v40, 2 }
 0x355   :  { %v520_v44 = vrot.slane %v519_v41, 1  ;;  %v529_v45 = vadd.f32 %v528_v42, %v527_v40 }
 0x357   :  { %v521_v46 = vadd.f32 %v520_v44, %v519_v41  ;;  %v530_v47 = vrot.slane %v529_v45, 1 }
 0x359   :  { %v522_v50 = vmul.f32 %v521_v46, %v1129_v49  ;;  %v531_v51 = vadd.f32 %v530_v47, %v529_v45 }
 0x35b   :  { %v532_v52 = vmul.f32 %v531_v51, %v1129_v49  ;;  %v533_v53 = vmul.f32 %v522_v50, %v522_v50 }
 0x35d   :  { %v534_v55 = vsub.f32 %v532_v52, %v533_v53 }
 0x35f   :  { %v535_v56 = vmax.f32 %v534_v55, 0.0 }
 0x361   :  { %v536_v58 = vadd.f32 1e-05, %v535_v56 }
 0x363   :  { %901 = vrsqrt.f32 %v536_v58  ;;  %vm543_vm10 = vweird.f32 %v536_v58 }
 0x369   :  { %v902_v59 = vpop.eup %901 }
 0x36a   :  { %v538_v60 = vmul.f32 %v902_v59, %v536_v58  ;;  %vm544_vm9 = vweird.f32 %v902_v59 }
 0x36b   :  { %vm545_vm11 = vmor %vm543_vm10, %vm544_vm9 }
 0x36c   :  { %v539_v61 = vmul.f32 %v902_v59, %v538_v60 }
 0x36e   :  { %v540_v62 = vmul.f32 0.5, %v539_v61 }
 0x370   :  { %v541_v63 = vsub.f32 1.5, %v540_v62 }
 0x372   :  { %v542_v0 = vmul.f32 %v902_v59, %v541_v63 }
 0x374   :  { %v546_v1 = vsel %vm545_vm11, %v902_v59, %v542_v0 }
 0x375   :  { %v547_v3 = vmul.f32 %v546_v1, %v1133_v4 }
 0x377   :  { %v548_v5 = vmul.f32 %v547_v3, %v522_v50  ;;  %v553_v7 = vperm.slane %v547_v3, 4 }
 0x379   :  { %v550_v6 = vrot.slane %v548_v5, 7  ;;  %v554_v9 = vmul.f32 %v553_v7, %v508_v24  ;;  %v555_v10 = vmul.f32 %v553_v7, %v510_v29 }
 0x37b   :  { %v552_v8 = vsub.f32 %v1133_v4, %v550_v6 }
 0x37d   :  { %v556_v11 = vperm.slane %v552_v8, 5 }
 0x37f   :  { %v558_v12 = vadd.f32 %v556_v11, %v555_v10  ;;  %v557_v13 = vadd.f32 %v556_v11, %v554_v9 }
 0x381   :  { %v560_v14 = vmax.f32 %v558_v12, 0.0  ;;  %v559_v15 = vmax.f32 %v557_v13, 0.0 }
 0x383   :  { %v561_v16 = vpack.c.bf16 %v560_v14, %v559_v15 }
 0x385   :  { %635 = vmatmul.bf16.vlgmr.msrb.gmra.mxu3 %v561_v16 }
 0x408   :  { %v636_v17 = vpop.f32.mrf.mxu3 }
 0x409   :  { %v641_v18 = vsel %vm1116_vm1, %v636_v17, 0.0 }
 0x40a   :  { %v651_v21 = vmul.f32 %v641_v18, %v641_v18 }
 0x410   :  { %v638_v19 = vpop.f32.mrf.mxu3 }
 0x411   :  { %v642_v20 = vsel %vm1120_vm2, %v638_v19, 0.0 }
 0x412   :  { %v643_v22 = vadd.f32 %v642_v20, %v641_v18  ;;  %v652_v25 = vmul.f32 %v642_v20, %v642_v20 }
 0x414   :  { %v644_v24 = vrot.slane %v643_v22, 4  ;;  %v653_v2 = vadd.f32 %v652_v25, %v651_v21 }
 0x416   :  { %v645_v26 = vadd.f32 %v644_v24, %v643_v22  ;;  %v654_v29 = vrot.slane %v653_v2, 4 }
 0x418   :  { %v646_v23 = vrot.slane %v645_v26, 2  ;;  %v655_v30 = vadd.f32 %v654_v29, %v653_v2 }
 0x41a   :  { %v647_v31 = vadd.f32 %v646_v23, %v645_v26  ;;  %v656_v32 = vrot.slane %v655_v30, 2 }
 0x41c   :  { %v648_v33 = vrot.slane %v647_v31, 1  ;;  %v657_v34 = vadd.f32 %v656_v32, %v655_v30 }
 0x41e   :  { %v649_v35 = vadd.f32 %v648_v33, %v647_v31  ;;  %v658_v27 = vrot.slane %v657_v34, 1 }
 0x420   :  { %v650_v36 = vmul.f32 %v649_v35, %v1129_v49  ;;  %v659_v37 = vadd.f32 %v658_v27, %v657_v34 }
 0x422   :  { %v660_v28 = vmul.f32 %v659_v37, %v1129_v49  ;;  %v661_v38 = vmul.f32 %v650_v36, %v650_v36 }
 0x424   :  { %v662_v39 = vsub.f32 %v660_v28, %v661_v38 }
 0x426   :  { %v663_v40 = vmax.f32 %v662_v39, 0.0 }
 0x428   :  { %v664_v41 = vadd.f32 1e-05, %v663_v40 }
 0x42a   :  { %903 = vrsqrt.f32 %v664_v41  ;;  %vm671_vm13 = vweird.f32 %v664_v41 }
 0x430   :  { %v904_v42 = vpop.eup %903 }
 0x431   :  { %v666_v43 = vmul.f32 %v904_v42, %v664_v41  ;;  %vm672_vm12 = vweird.f32 %v904_v42 }
 0x432   :  { %vm673_vm14 = vmor %vm671_vm13, %vm672_vm12 }
 0x433   :  { %v667_v44 = vmul.f32 %v904_v42, %v666_v43 }
 0x435   :  { %v668_v45 = vmul.f32 0.5, %v667_v44 }
 0x437   :  { %v669_v46 = vsub.f32 1.5, %v668_v45 }
 0x439   :  { %v670_v47 = vmul.f32 %v904_v42, %v669_v46 }
 0x43b   :  { %v674_v48 = vsel %vm673_vm14, %v904_v42, %v670_v47 }
 0x43c   :  { %v675_v50 = vmul.f32 %v674_v48, %v1133_v4 }
 0x43e   :  { %v676_v51 = vmul.f32 %v675_v50, %v650_v36  ;;  %v681_v49 = vperm.slane %v675_v50, 6 }
 0x440   :  { %v678_v52 = vrot.slane %v676_v51, 7  ;;  %v682_v54 = vmul.f32 %v681_v49, %v636_v17  ;;  %v683_v55 = vmul.f32 %v681_v49, %v638_v19 }
 0x442   :  { %v680_v53 = vsub.f32 %v1133_v4, %v678_v52 }
 0x444   :  { %v684_v56 = vperm.slane %v680_v53, 7 }
 0x446   :  { %v685_v57 = vadd.f32 %v684_v56, %v682_v54  ;;  %v686_v58 = vadd.f32 %v684_v56, %v683_v55 }
 0x448   :  { %v687_v59 = vmax.f32 %v685_v57, 0.0  ;;  %v688_v60 = vmax.f32 %v686_v58, 0.0 }
 0x44a   :  { %689 = vst [vmem:[#allocation13] sm:$0xff] %v687_v59 }
 0x44b   :  { %690 = vst [vmem:[#allocation13 + $0x8] sm:$0xff] %v688_v60 }
 0x44c   :  { %703 = dma.vmem_to_hbm [thread:$0]  %s696_s25, 256, %s698_s28, [#allocation5], %s1055_s29, %s1055_s29, %s1056_s30  }
 0x44d   :  { %1045 = dma.done.wait [#allocation5], 256  }
 0x44e   :  { %1046 = vsyncadd [#allocation5], 4294967040 }
 0x44f   :  { %708 = vsyncpa [#allocation4], 1 }
 0x450   :  { %709 = vsyncpa [#allocation9], 1 }
 0x451   :  { %710 = vsyncpa [#allocation12], 1 }
 0x452   :  { %711 = vsyncpa [#allocation5], 1 }
 0x453   :  { %712 = vsyncpa [#allocation6], 1 }

</bundles_post_ra>
